<compile_context>
chip_gen: v5e
topology: v5e:2x2
jax: 0.10.0
libtpu: 0.0.40
codegen_flags: <defaults>
</compile_context>

<pallas_src>
import functools

import numpy as np
import jax
import jax.numpy as jnp
from jax import lax
from jax.experimental import pallas as pl
from jax.experimental.pallas import tpu as pltpu

EPS = 1e-5
BF16 = jnp.bfloat16


# ----------------------------------------------------------------------------
# Pass 1: adaptive avg-pool (reduction over HW tiles) + per-stage 1x1 conv
#         + folded BN + ReLU + cross-stage block mask  ->  h^T  (per image)
# ----------------------------------------------------------------------------
def _psp_pool_kernel(x_ref, pt_ref, wct_ref, cbias_ref, h_ref, acc_ref, *,
                     c4, nst, col_starts):
    t = pl.program_id(1)                       # HW-tile index (reduction axis)

    @pl.when(t == 0)
    def _init():
        acc_ref[...] = jnp.zeros_like(acc_ref)

    # pooled^T partial sum: (C, HWt) @ (HWt, S_all) on the MXU, f32 accumulate.
    acc_ref[...] += jnp.dot(x_ref[0], pt_ref[...],
                            preferred_element_type=jnp.float32)

    @pl.when(t == pl.num_programs(1) - 1)
    def _finalize():
        pooled_t = acc_ref[...].astype(BF16)                         # (C, S_all)
        # All stages' 1x1 convs at once (BN scale pre-folded into wct).
        h = jnp.dot(wct_ref[...], pooled_t,
                    preferred_element_type=jnp.float32)              # (nst*c4, S_all)
        h = jnp.maximum(h + cbias_ref[...], 0.0)                     # f32 tail
        # Cross-stage block mask generated in-kernel from iota compares:
        # row r belongs to stage r // c4; column c to the stage whose pooled
        # positions cover c.  Keep only matching blocks (applied AFTER
        # bias+ReLU, which is required for correctness).
        r = lax.broadcasted_iota(jnp.int32, h.shape, 0)
        c = lax.broadcasted_iota(jnp.int32, h.shape, 1)
        row_stage = jnp.zeros(h.shape, jnp.int32)
        col_stage = jnp.zeros(h.shape, jnp.int32)
        for i in range(1, nst):
            row_stage = row_stage + (r >= i * c4).astype(jnp.int32)
            col_stage = col_stage + (c >= col_starts[i]).astype(jnp.int32)
        h = jnp.where(row_stage == col_stage, h, 0.0)
        h_ref[0] = h.astype(h_ref.dtype)


# ----------------------------------------------------------------------------
# Pass 2: bilinear upsample (all stages at once) + bottleneck 1x1 conv on the
#         (never materialized) concat + final 1x1 conv, per HW tile.
# ----------------------------------------------------------------------------
def _psp_decode_kernel(x_ref, h_ref, bt_ref, wb_top_ref, wb_x_ref, bnb_ref,
                       wf_t_ref, bf_ref, o_ref):
    x_t = x_ref[0]                                    # (C, HWt)       bf16
    h_t = h_ref[0]                                    # (nst*C4, S_all) bf16
    # priors^T tile: (nst*C4, S_all) @ (S_all, HWt)
    priors_t = jnp.dot(h_t, bt_ref[...],
                       preferred_element_type=jnp.float32)
    # Bottleneck 1x1 conv over concat([priors, x]) without the concat:
    # split weight columns, sum partial matmuls.  (The module's outer ReLU is
    # idempotent after the BN ReLU.)
    bottle_t = (jnp.dot(wb_top_ref[...], priors_t.astype(BF16),
                        preferred_element_type=jnp.float32)
                + jnp.dot(wb_x_ref[...], x_t,
                          preferred_element_type=jnp.float32))       # (Cmid, HWt)
    bottle_t = jnp.maximum(bottle_t + bnb_ref[...], 0.0)             # f32 tail
    # Final 1x1 conv: (ncls, Cmid) @ (Cmid, HWt) -> lane-dense store.
    out_t = jnp.dot(wf_t_ref[...], bottle_t.astype(BF16),
                    preferred_element_type=jnp.float32) + bf_ref[...]
    o_ref[0] = out_t


# ----------------------------------------------------------------------------
# Host-side constant operators, parameter init, VMEM budgeting
# ----------------------------------------------------------------------------
def adaptive_pool_matrix(in_size, out_size):
    """PyTorch AdaptiveAvgPool2d (1D factor): row i averages [floor(i*I/O), ceil((i+1)*I/O))."""
    P = np.zeros((out_size, in_size), np.float32)
    for i in range(out_size):
        start = (i * in_size) // out_size
        end = -((-(i + 1) * in_size) // out_size)   # ceil((i+1)*in/out)
        P[i, start:end] = 1.0 / (end - start)
    return P


def upsample_matrix(out_size, in_size):
    """1D bilinear interpolation matrix, align_corners=True."""
    U = np.zeros((out_size, in_size), np.float32)
    if in_size == 1:
        U[:, 0] = 1.0
        return U
    for h in range(out_size):
        src = h * (in_size - 1) / (out_size - 1)
        i0 = int(np.floor(src))
        i1 = min(i0 + 1, in_size - 1)
        w1 = src - i0
        U[h, i0] += 1.0 - w1
        U[h, i1] += w1
    return U


def fold_bn(gamma, beta, mean, var):
    scale = gamma / jnp.sqrt(var + EPS)
    bias = beta - mean * scale
    return scale[None, :], bias[None, :]


def init_params(key, in_features, out_features, n_classes, sizes):
    C, C4, Cmid = in_features, in_features // 4, out_features
    Ccat = len(sizes) * C4 + C                 # width of concat([priors..., x])
    ks = list(jax.random.split(key, 5 * len(sizes) + 7))
    ki = iter(ks)
    stage_params = []
    for _ in sizes:
        Wc = 0.1 * jax.random.normal(next(ki), (C, C4), jnp.float32)
        gamma = jax.random.uniform(next(ki), (C4,), jnp.float32, 0.5, 1.5)
        beta = 0.1 * jax.random.normal(next(ki), (C4,), jnp.float32)
        mean = 0.1 * jax.random.normal(next(ki), (C4,), jnp.float32)
        var = jax.random.uniform(next(ki), (C4,), jnp.float32, 0.5, 1.5)
        sc, bi = fold_bn(gamma, beta, mean, var)
        stage_params.append((Wc, sc, bi))
    Wb = 0.1 * jax.random.normal(next(ki), (Ccat, Cmid), jnp.float32)
    gb = jax.random.uniform(next(ki), (Cmid,), jnp.float32, 0.5, 1.5)
    bb = 0.1 * jax.random.normal(next(ki), (Cmid,), jnp.float32)
    mb = 0.1 * jax.random.normal(next(ki), (Cmid,), jnp.float32)
    vb = jax.random.uniform(next(ki), (Cmid,), jnp.float32, 0.5, 1.5)
    scb, bib = fold_bn(gb, bb, mb, vb)
    Wf = 0.1 * jax.random.normal(next(ki), (Cmid, n_classes), jnp.float32)
    bf = 0.1 * jax.random.normal(next(ki), (1, n_classes), jnp.float32)
    return stage_params, (Wb, scb, bib, Wf, bf)


def _padded_block_bytes(shape, dtype):
    """Approximate VMEM bytes of one buffer after (8,128) tile padding."""
    shape = tuple(int(s) for s in shape)
    if len(shape) == 1:
        shape = (1,) + shape
    lead = 1
    for s in shape[:-2]:
        lead *= s
    sub = -(-shape[-2] // 8) * 8
    lane = -(-shape[-1] // 128) * 128
    return lead * sub * lane * np.dtype(dtype).itemsize


def _vmem_limit_bytes(buffers):
    """buffers: iterable of (block_shape, dtype, buffer_count).  +50% headroom,
    floored at the 32 MiB default and capped below physical VMEM."""
    est = sum(_padded_block_bytes(s, d) * n for (s, d, n) in buffers)
    return int(min(max(int(est * 1.5), 32 * 1024 * 1024), 100 * 1024 * 1024))


def _pick_hw_tile(hw, target=512):
    if hw % 128 != 0:
        return hw                      # fall back to a single full-HW block
    best, t = 128, 128
    while t <= min(hw, target):
        if hw % t == 0:
            best = t
        t += 128
    return best


# ----------------------------------------------------------------------------
# Forward pass
# ----------------------------------------------------------------------------
def psp_forward_pallas(x_nchw, stage_params, bottle_params, sizes, hw_tile=None):
    N, C, H, W = x_nchw.shape
    HW = H * W
    C4 = stage_params[0][0].shape[1]
    nst = len(sizes)
    nstC4 = nst * C4
    Wb, scb, bib, Wf, bfin = bottle_params
    Cmid = Wb.shape[1]
    ncls = Wf.shape[1]

    if hw_tile is None:
        hw_tile = _pick_hw_tile(HW)
    if HW % hw_tile != 0 or (hw_tile != HW and hw_tile % 128 != 0):
        raise ValueError(f"bad hw_tile={hw_tile} for HW={HW}")
    n_tiles = HW // hw_tile

    # ---- host-side constant operators, stacked over stages (transposed) ----
    P_rows, B_cols, col_starts = [], [], [0]
    for s in sizes:
        P_rows.append(np.kron(adaptive_pool_matrix(H, s), adaptive_pool_matrix(W, s)))
        B_cols.append(np.kron(upsample_matrix(H, s), upsample_matrix(W, s)))
        col_starts.append(col_starts[-1] + s * s)
    S_all = col_starts[-1]
    PT = jnp.asarray(np.concatenate(P_rows, axis=0).T).astype(BF16)    # (HW, S_all)
    BT = jnp.asarray(np.concatenate(B_cols, axis=1).T).astype(BF16)    # (S_all, HW)

    # ---- fold BN scale into the 1x1-conv weights, transpose for the
    #      channels-on-sublanes layout, cast MXU operands to bf16 ----
    WcT = jnp.concatenate([Wc * sc for (Wc, sc, _) in stage_params],
                          axis=1).T.astype(BF16)                       # (nst*C4, C)
    cbias = jnp.concatenate([bi for (_, _, bi) in stage_params],
                            axis=1).reshape(nstC4, 1)                  # f32
    Wb_f = Wb * scb
    WbT_top = Wb_f[:nstC4].T.astype(BF16)                              # (Cmid, nst*C4)
    WbT_x = Wb_f[nstC4:].T.astype(BF16)                                # (Cmid, C)
    bnb = bib.reshape(Cmid, 1)                                         # f32
    WfT = Wf.T.astype(BF16)                                            # (ncls, Cmid)
    bfc = bfin.reshape(ncls, 1)                                        # f32

    # NCHW flattens straight into the (N, C, HW) kernel layout: no transpose.
    xT = x_nchw.reshape(N, C, HW).astype(BF16)

    pool_kernel = functools.partial(_psp_pool_kernel, c4=C4, nst=nst,
                                    col_starts=tuple(col_starts))

    def _wspec(shape, single_buffer):
        """Grid-invariant (weight) operand; single-buffered when supported."""
        idx = lambda n, t: (0,) * len(shape)
        if single_buffer:
            return pl.BlockSpec(shape, idx, pipeline_mode=pl.Buffered(1))
        return pl.BlockSpec(shape, idx)

    def _run(single_buffer):
        wbuf = 1 if single_buffer else 2

        vmem1 = _vmem_limit_bytes([
            ((1, C, hw_tile), BF16, 2), ((hw_tile, S_all), BF16, 2),
            ((nstC4, C), BF16, wbuf), ((nstC4, 1), jnp.float32, wbuf),
            ((1, nstC4, S_all), BF16, 2), ((C, S_all), jnp.float32, 1)])
        h_t = pl.pallas_call(
            pool_kernel,
            out_shape=jax.ShapeDtypeStruct((N, nstC4, S_all), BF16),
            grid=(N, n_tiles),
            in_specs=[
                pl.BlockSpec((1, C, hw_tile), lambda n, t: (n, 0, t)),    # x^T tile
                pl.BlockSpec((hw_tile, S_all), lambda n, t: (t, 0)),      # pool op tile
                _wspec((nstC4, C), single_buffer),                        # Wc^T (BN folded)
                _wspec((nstC4, 1), single_buffer),                        # stage BN bias
            ],
            out_specs=pl.BlockSpec((1, nstC4, S_all), lambda n, t: (n, 0, 0)),
            scratch_shapes=[pltpu.VMEM((C, S_all), jnp.float32)],
            compiler_params=pltpu.CompilerParams(
                dimension_semantics=("parallel", "arbitrary"),
                vmem_limit_bytes=vmem1),
        )(xT, PT, WcT, cbias)

        vmem2 = _vmem_limit_bytes([
            ((1, C, hw_tile), BF16, 2), ((1, nstC4, S_all), BF16, 2),
            ((S_all, hw_tile), BF16, 2), ((Cmid, nstC4), BF16, wbuf),
            ((Cmid, C), BF16, wbuf), ((Cmid, 1), jnp.float32, wbuf),
            ((ncls, Cmid), BF16, wbuf), ((ncls, 1), jnp.float32, wbuf),
            ((1, ncls, hw_tile), jnp.float32, 2)])
        out_t = pl.pallas_call(
            _psp_decode_kernel,
            out_shape=jax.ShapeDtypeStruct((N, ncls, HW), jnp.float32),
            grid=(N, n_tiles),
            in_specs=[
                pl.BlockSpec((1, C, hw_tile), lambda n, t: (n, 0, t)),    # x^T tile
                pl.BlockSpec((1, nstC4, S_all), lambda n, t: (n, 0, 0)),  # h^T (per image)
                pl.BlockSpec((S_all, hw_tile), lambda n, t: (0, t)),      # upsample op tile
                _wspec((Cmid, nstC4), single_buffer),                     # Wb^T (prior rows)
                _wspec((Cmid, C), single_buffer),                         # Wb^T (x rows)
                _wspec((Cmid, 1), single_buffer),                         # bottleneck BN bias
                _wspec((ncls, Cmid), single_buffer),                      # Wf^T
                _wspec((ncls, 1), single_buffer),                         # final bias
            ],
            out_specs=pl.BlockSpec((1, ncls, hw_tile), lambda n, t: (n, 0, t)),
            compiler_params=pltpu.CompilerParams(
                dimension_semantics=("parallel", "parallel"),
                vmem_limit_bytes=vmem2),
        )(xT, h_t, BT, WbT_top, WbT_x, bnb, WfT, bfc)
        return out_t

    try:
        out_t = _run(single_buffer=True)
    except Exception:
        # pl.Buffered(1) not supported by this jax version: default buffering.
        out_t = _run(single_buffer=False)

    # (N, ncls, HW) is already NCHW-ordered; just unflatten the spatial dim.
    return out_t.reshape(N, ncls, H, W)


def psp_forward_reference(x_nchw, stage_params, bottle_params, sizes):
    """Pure-JAX reference (per stage, unfused) mirroring the kernel's
    bf16-operand / f32-accumulate numerics."""
    N, C, H, W = x_nchw.shape
    HW = H * W
    xT = x_nchw.reshape(N, C, HW).astype(BF16)
    Wb, scb, bib, Wf, bfin = bottle_params

    priors = []
    for s, (Wc, sc, bi) in zip(sizes, stage_params):
        P = jnp.asarray(np.kron(adaptive_pool_matrix(H, s),
                                adaptive_pool_matrix(W, s))).astype(BF16)   # (s*s, HW)
        B = jnp.asarray(np.kron(upsample_matrix(H, s),
                                upsample_matrix(W, s))).astype(BF16)        # (HW, s*s)
        pooled = jnp.einsum('nch,ph->ncp', xT, P,
                            preferred_element_type=jnp.float32)
        h = jnp.einsum('cd,ncp->ndp', (Wc * sc).astype(BF16),
                       pooled.astype(BF16), preferred_element_type=jnp.float32)
        h = jnp.maximum(h + bi.reshape(1, -1, 1), 0.0).astype(BF16)
        prior = jnp.einsum('ndp,hp->ndh', h, B,
                           preferred_element_type=jnp.float32)
        priors.append(prior.astype(BF16))
    zT = jnp.concatenate(priors + [xT], axis=1)                      # (N, Ccat, HW)

    bot = jnp.einsum('cm,nch->nmh', (Wb * scb).astype(BF16), zT,
                     preferred_element_type=jnp.float32)
    bot = jnp.maximum(bot + bib.reshape(1, -1, 1), 0.0).astype(BF16)
    out = jnp.einsum('mk,nmh->nkh', Wf.astype(BF16), bot,
                     preferred_element_type=jnp.float32) + bfin.reshape(1, -1, 1)
    ncls = Wf.shape[1]
    return out.reshape(N, ncls, H, W)


if __name__ == "__main__":
    # Small shapes consistent with PSPModule(in_features=32, out_features=16,
    # sizes=(1,2,3,6), n_classes=1); input x: (N=2, C=32, H=16, W=16) NCHW.
    sizes = (1, 2, 3, 6)
    in_features, out_features, n_classes = 32, 16, 1
    N, H, W = 2, 16, 16

    key = jax.random.PRNGKey(0)
    kx, kp = jax.random.split(key)
    x = jax.random.normal(kx, (N, in_features, H, W), jnp.float32)

    stage_params, bottle_params = init_params(kp, in_features, out_features,
                                              n_classes, sizes)

    # hw_tile=128 -> two spatial tiles, exercising the tiled reduction path.
    out = psp_forward_pallas(x, stage_params, bottle_params, sizes, hw_tile=128)
    out = jax.block_until_ready(out)

    ref = psp_forward_reference(x, stage_params, bottle_params, sizes)
    ref = jax.block_until_ready(ref)

    assert out.shape == (N, n_classes, H, W), out.shape
    max_err = float(jnp.max(jnp.abs(out - ref)))
    assert jnp.allclose(out, ref, atol=5e-3, rtol=5e-3), max_err

    print("KERNEL_OK")
</pallas_src>

<mosaic_0001>
module attributes {stable_mosaic.version = 11 : i64} {
  func.func @_psp_pool_kernel(%arg0: i32, %arg1: i32, %arg2: memref<1x32x128xbf16, #tpu.memory_space<vmem>>, %arg3: memref<128x50xbf16, #tpu.memory_space<vmem>>, %arg4: memref<32x32xbf16, #tpu.memory_space<vmem>>, %arg5: memref<32x1xf32, #tpu.memory_space<vmem>>, %arg6: memref<1x32x50xbf16, #tpu.memory_space<vmem>>, %arg7: memref<32x50xf32, #tpu.memory_space<vmem>>) attributes {dimension_semantics = [#tpu.dimension_semantics<parallel>, #tpu.dimension_semantics<arbitrary>], iteration_bounds = array<i64: 2, 2>, scalar_prefetch = 0 : i64, scratch_operands = 1 : i64, tpu.core_type = #tpu.core_type<tc>, window_params = [{transform_indices = @transform_0, window_bounds = array<i64: 1, 32, 128>}, {transform_indices = @transform_1, window_bounds = array<i64: 128, 50>}, {pipeline_mode = #tpu.pipeline_mode<synchronous>, transform_indices = @transform_2, window_bounds = array<i64: 32, 32>}, {pipeline_mode = #tpu.pipeline_mode<synchronous>, transform_indices = @transform_3, window_bounds = array<i64: 32, 1>}, {transform_indices = @transform_4, window_bounds = array<i64: 1, 32, 50>}]} {
    %c0_i32 = arith.constant 0 : i32
    %0 = arith.cmpi eq, %arg1, %c0_i32 : i32
    %1 = arith.extui %0 : i1 to i32
    %c0_i32_0 = arith.constant 0 : i32
    %2 = arith.cmpi ne, %1, %c0_i32_0 : i32
    scf.if %2 {
      %cst_10 = arith.constant 0.000000e+00 : f32
      %13 = vector.broadcast %cst_10 : f32 to vector<32x50xf32>
      %c0_11 = arith.constant 0 : index
      %c0_12 = arith.constant 0 : index
      %14 = vector.load %arg7[%c0_11, %c0_12] : memref<32x50xf32, #tpu.memory_space<vmem>>, vector<32x50xf32>
      tpu.vector_store %arg7[%c0_11, %c0_12], %13 {strides = array<i32>} : memref<32x50xf32, #tpu.memory_space<vmem>>, vector<32x50xf32>,
    } else {
    }
    %c0 = arith.constant 0 : index
    %c0_1 = arith.constant 0 : index
    %3 = vector.load %arg7[%c0, %c0_1] : memref<32x50xf32, #tpu.memory_space<vmem>>, vector<32x50xf32>
    %c0_2 = arith.constant 0 : index
    %c0_3 = arith.constant 0 : index
    %c0_4 = arith.constant 0 : index
    %4 = vector.load %arg2[%c0_2, %c0_3, %c0_4] : memref<1x32x128xbf16, #tpu.memory_space<vmem>>, vector<1x32x128xbf16>
    %5 = vector.shape_cast %4 : vector<1x32x128xbf16> to vector<32x128xbf16>
    %c0_5 = arith.constant 0 : index
    %c0_6 = arith.constant 0 : index
    %6 = vector.load %arg3[%c0_5, %c0_6] : memref<128x50xbf16, #tpu.memory_space<vmem>>, vector<128x50xbf16>
    %cst = arith.constant dense<0.000000e+00> : vector<32x50xf32>
    %7 = tpu.matmul %5, %6, %cst {dimension_numbers = #tpu.dot_dimension_numbers<[1], [0], [0], [1], [0, 0, 1, 1], [], []>} : vector<32x128xbf16>, vector<128x50xbf16>, vector<32x50xf32> -> vector<32x50xf32>
    %8 = arith.addf %3, %7 : vector<32x50xf32>
    %c0_7 = arith.constant 0 : index
    %c0_8 = arith.constant 0 : index
    %9 = vector.load %arg7[%c0_7, %c0_8] : memref<32x50xf32, #tpu.memory_space<vmem>>, vector<32x50xf32>
    tpu.vector_store %arg7[%c0_7, %c0_8], %8 {strides = array<i32>} : memref<32x50xf32, #tpu.memory_space<vmem>>, vector<32x50xf32>,
    %c1_i32 = arith.constant 1 : i32
    %10 = arith.cmpi eq, %arg1, %c1_i32 : i32
    %11 = arith.extui %10 : i1 to i32
    %c0_i32_9 = arith.constant 0 : i32
    %12 = arith.cmpi ne, %11, %c0_i32_9 : i32
    scf.if %12 {
      %c0_10 = arith.constant 0 : index
      %c0_11 = arith.constant 0 : index
      %13 = vector.load %arg7[%c0_10, %c0_11] : memref<32x50xf32, #tpu.memory_space<vmem>>, vector<32x50xf32>
      %14 = arith.truncf %13 : vector<32x50xf32> to vector<32x50xbf16>
      %c0_12 = arith.constant 0 : index
      %c0_13 = arith.constant 0 : index
      %15 = vector.load %arg4[%c0_12, %c0_13] : memref<32x32xbf16, #tpu.memory_space<vmem>>, vector<32x32xbf16>
      %cst_14 = arith.constant dense<0.000000e+00> : vector<32x50xf32>
      %16 = tpu.matmul %15, %14, %cst_14 {dimension_numbers = #tpu.dot_dimension_numbers<[1], [0], [0], [1], [0, 0, 1, 1], [], []>} : vector<32x32xbf16>, vector<32x50xbf16>, vector<32x50xf32> -> vector<32x50xf32>
      %c0_15 = arith.constant 0 : index
      %c0_16 = arith.constant 0 : index
      %17 = vector.load %arg5[%c0_15, %c0_16] : memref<32x1xf32, #tpu.memory_space<vmem>>, vector<32x1xf32>
      %18 = vector.broadcast %17 : vector<32x1xf32> to vector<32x50xf32>
      %19 = arith.addf %16, %18 : vector<32x50xf32>
      %cst_17 = arith.constant 0.000000e+00 : f32
      %20 = vector.broadcast %cst_17 : f32 to vector<32x50xf32>
      %21 = arith.maximumf %19, %20 : vector<32x50xf32>
      %22 = tpu.iota {dimensions = array<i32: 0>} : vector<32x50xi32>
      %23 = tpu.iota {dimensions = array<i32: 1>} : vector<32x50xi32>
      %c0_i32_18 = arith.constant 0 : i32
      %24 = vector.broadcast %c0_i32_18 : i32 to vector<32x50xi32>
      %c0_i32_19 = arith.constant 0 : i32
      %25 = vector.broadcast %c0_i32_19 : i32 to vector<32x50xi32>
      %c8_i32 = arith.constant 8 : i32
      %26 = vector.broadcast %c8_i32 : i32 to vector<32x50xi32>
      %27 = arith.cmpi sge, %22, %26 : vector<32x50xi32>
      %28 = arith.extui %27 : vector<32x50xi1> to vector<32x50xi32>
      %29 = arith.addi %24, %28 : vector<32x50xi32>
      %c1_i32_20 = arith.constant 1 : i32
      %30 = vector.broadcast %c1_i32_20 : i32 to vector<32x50xi32>
      %31 = arith.cmpi sge, %23, %30 : vector<32x50xi32>
      %32 = arith.extui %31 : vector<32x50xi1> to vector<32x50xi32>
      %33 = arith.addi %25, %32 : vector<32x50xi32>
      %c16_i32 = arith.constant 16 : i32
      %34 = vector.broadcast %c16_i32 : i32 to vector<32x50xi32>
      %35 = arith.cmpi sge, %22, %34 : vector<32x50xi32>
      %36 = arith.extui %35 : vector<32x50xi1> to vector<32x50xi32>
      %37 = arith.addi %29, %36 : vector<32x50xi32>
      %c5_i32 = arith.constant 5 : i32
      %38 = vector.broadcast %c5_i32 : i32 to vector<32x50xi32>
      %39 = arith.cmpi sge, %23, %38 : vector<32x50xi32>
      %40 = arith.extui %39 : vector<32x50xi1> to vector<32x50xi32>
      %41 = arith.addi %33, %40 : vector<32x50xi32>
      %c24_i32 = arith.constant 24 : i32
      %42 = vector.broadcast %c24_i32 : i32 to vector<32x50xi32>
      %43 = arith.cmpi sge, %22, %42 : vector<32x50xi32>
      %44 = arith.extui %43 : vector<32x50xi1> to vector<32x50xi32>
      %45 = arith.addi %37, %44 : vector<32x50xi32>
      %c14_i32 = arith.constant 14 : i32
      %46 = vector.broadcast %c14_i32 : i32 to vector<32x50xi32>
      %47 = arith.cmpi sge, %23, %46 : vector<32x50xi32>
      %48 = arith.extui %47 : vector<32x50xi1> to vector<32x50xi32>
      %49 = arith.addi %41, %48 : vector<32x50xi32>
      %50 = arith.cmpi eq, %45, %49 : vector<32x50xi32>
      %cst_21 = arith.constant 0.000000e+00 : f32
      %51 = vector.broadcast %cst_21 : f32 to vector<32x50xf32>
      %52 = arith.select %50, %21, %51 : vector<32x50xi1>, vector<32x50xf32>
      %53 = arith.truncf %52 : vector<32x50xf32> to vector<32x50xbf16>
      %c0_22 = arith.constant 0 : index
      %c0_23 = arith.constant 0 : index
      %c0_24 = arith.constant 0 : index
      %54 = vector.load %arg6[%c0_22, %c0_23, %c0_24] : memref<1x32x50xbf16, #tpu.memory_space<vmem>>, vector<1x32x50xbf16>
      %55 = vector.shape_cast %54 : vector<1x32x50xbf16> to vector<32x50xbf16>
      %56 = vector.shape_cast %53 : vector<32x50xbf16> to vector<1x32x50xbf16>
      tpu.vector_store %arg6[%c0_22, %c0_23, %c0_24], %56 {strides = array<i32>} : memref<1x32x50xbf16, #tpu.memory_space<vmem>>, vector<1x32x50xbf16>,
    } else {
    }
    return
  }
  func.func @transform_0(%arg0: i32, %arg1: i32) -> (i32, i32, i32) {
    %c0_i32 = arith.constant 0 : i32
    %c0_i32_0 = arith.constant 0 : i32
    return %arg0, %c0_i32, %arg1 : i32, i32, i32
  }
  func.func @transform_1(%arg0: i32, %arg1: i32) -> (i32, i32) {
    %c0_i32 = arith.constant 0 : i32
    %c0_i32_0 = arith.constant 0 : i32
    return %arg1, %c0_i32 : i32, i32
  }
  func.func @transform_2(%arg0: i32, %arg1: i32) -> (i32, i32) {
    %c0_i32 = arith.constant 0 : i32
    %c0_i32_0 = arith.constant 0 : i32
    %c0_i32_1 = arith.constant 0 : i32
    return %c0_i32, %c0_i32_0 : i32, i32
  }
  func.func @transform_3(%arg0: i32, %arg1: i32) -> (i32, i32) {
    %c0_i32 = arith.constant 0 : i32
    %c0_i32_0 = arith.constant 0 : i32
    %c0_i32_1 = arith.constant 0 : i32
    return %c0_i32, %c0_i32_0 : i32, i32
  }
  func.func @transform_4(%arg0: i32, %arg1: i32) -> (i32, i32, i32) {
    %c0_i32 = arith.constant 0 : i32
    %c0_i32_0 = arith.constant 0 : i32
    %c0_i32_1 = arith.constant 0 : i32
    return %arg0, %c0_i32, %c0_i32_0 : i32, i32, i32
  }
}

module attributes {stable_mosaic.version = 11 : i64} {
  func.func @_psp_pool_kernel(%arg0: i32, %arg1: i32, %arg2: memref<1x32x128xbf16, #tpu.memory_space<vmem>>, %arg3: memref<128x50xbf16, #tpu.memory_space<vmem>>, %arg4: memref<32x32xbf16, #tpu.memory_space<vmem>>, %arg5: memref<32x1xf32, #tpu.memory_space<vmem>>, %arg6: memref<1x32x50xbf16, #tpu.memory_space<vmem>>, %arg7: memref<32x50xf32, #tpu.memory_space<vmem>>) attributes {dimension_semantics = [#tpu.dimension_semantics<parallel>, #tpu.dimension_semantics<arbitrary>], iteration_bounds = array<i64: 2, 2>, scalar_prefetch = 0 : i64, scratch_operands = 1 : i64, tpu.core_type = #tpu.core_type<tc>, window_params = [{transform_indices = @transform_0, window_bounds = array<i64: 1, 32, 128>}, {transform_indices = @transform_1, window_bounds = array<i64: 128, 50>}, {pipeline_mode = #tpu.pipeline_mode<synchronous>, transform_indices = @transform_2, window_bounds = array<i64: 32, 32>}, {pipeline_mode = #tpu.pipeline_mode<synchronous>, transform_indices = @transform_3, window_bounds = array<i64: 32, 1>}, {transform_indices = @transform_4, window_bounds = array<i64: 1, 32, 50>}]} {
    %c0_i32 = arith.constant 0 : i32
    %0 = arith.cmpi eq, %arg1, %c0_i32 : i32
    %1 = arith.extui %0 : i1 to i32
    %c0_i32_0 = arith.constant 0 : i32
    %2 = arith.cmpi ne, %1, %c0_i32_0 : i32
    scf.if %2 {
      %cst_10 = arith.constant 0.000000e+00 : f32
      %13 = vector.broadcast %cst_10 : f32 to vector<32x50xf32>
      %c0_11 = arith.constant 0 : index
      %c0_12 = arith.constant 0 : index
      %14 = vector.load %arg7[%c0_11, %c0_12] : memref<32x50xf32, #tpu.memory_space<vmem>>, vector<32x50xf32>
      tpu.vector_store %arg7[%c0_11, %c0_12], %13 {strides = array<i32>} : memref<32x50xf32, #tpu.memory_space<vmem>>, vector<32x50xf32>,
    } else {
    }
    %c0 = arith.constant 0 : index
    %c0_1 = arith.constant 0 : index
    %3 = vector.load %arg7[%c0, %c0_1] : memref<32x50xf32, #tpu.memory_space<vmem>>, vector<32x50xf32>
    %c0_2 = arith.constant 0 : index
    %c0_3 = arith.constant 0 : index
    %c0_4 = arith.constant 0 : index
    %4 = vector.load %arg2[%c0_2, %c0_3, %c0_4] : memref<1x32x128xbf16, #tpu.memory_space<vmem>>, vector<1x32x128xbf16>
    %5 = vector.shape_cast %4 : vector<1x32x128xbf16> to vector<32x128xbf16>
    %c0_5 = arith.constant 0 : index
    %c0_6 = arith.constant 0 : index
    %6 = vector.load %arg3[%c0_5, %c0_6] : memref<128x50xbf16, #tpu.memory_space<vmem>>, vector<128x50xbf16>
    %cst = arith.constant dense<0.000000e+00> : vector<32x50xf32>
    %7 = tpu.matmul %5, %6, %cst {dimension_numbers = #tpu.dot_dimension_numbers<[1], [0], [0], [1], [0, 0, 1, 1], [], []>} : vector<32x128xbf16>, vector<128x50xbf16>, vector<32x50xf32> -> vector<32x50xf32>
    %8 = arith.addf %3, %7 : vector<32x50xf32>
    %c0_7 = arith.constant 0 : index
    %c0_8 = arith.constant 0 : index
    %9 = vector.load %arg7[%c0_7, %c0_8] : memref<32x50xf32, #tpu.memory_space<vmem>>, vector<32x50xf32>
    tpu.vector_store %arg7[%c0_7, %c0_8], %8 {strides = array<i32>} : memref<32x50xf32, #tpu.memory_space<vmem>>, vector<32x50xf32>,
    %c1_i32 = arith.constant 1 : i32
    %10 = arith.cmpi eq, %arg1, %c1_i32 : i32
    %11 = arith.extui %10 : i1 to i32
    %c0_i32_9 = arith.constant 0 : i32
    %12 = arith.cmpi ne, %11, %c0_i32_9 : i32
    scf.if %12 {
      %c0_10 = arith.constant 0 : index
      %c0_11 = arith.constant 0 : index
      %13 = vector.load %arg7[%c0_10, %c0_11] : memref<32x50xf32, #tpu.memory_space<vmem>>, vector<32x50xf32>
      %14 = arith.truncf %13 : vector<32x50xf32> to vector<32x50xbf16>
      %c0_12 = arith.constant 0 : index
      %c0_13 = arith.constant 0 : index
      %15 = vector.load %arg4[%c0_12, %c0_13] : memref<32x32xbf16, #tpu.memory_space<vmem>>, vector<32x32xbf16>
      %cst_14 = arith.constant dense<0.000000e+00> : vector<32x50xf32>
      %16 = tpu.matmul %15, %14, %cst_14 {dimension_numbers = #tpu.dot_dimension_numbers<[1], [0], [0], [1], [0, 0, 1, 1], [], []>} : vector<32x32xbf16>, vector<32x50xbf16>, vector<32x50xf32> -> vector<32x50xf32>
      %c0_15 = arith.constant 0 : index
      %c0_16 = arith.constant 0 : index
      %17 = vector.load %arg5[%c0_15, %c0_16] : memref<32x1xf32, #tpu.memory_space<vmem>>, vector<32x1xf32>
      %18 = vector.broadcast %17 : vector<32x1xf32> to vector<32x50xf32>
      %19 = arith.addf %16, %18 : vector<32x50xf32>
      %cst_17 = arith.constant 0.000000e+00 : f32
      %20 = vector.broadcast %cst_17 : f32 to vector<32x50xf32>
      %21 = arith.maximumf %19, %20 : vector<32x50xf32>
      %22 = tpu.iota {dimensions = array<i32: 0>} : vector<32x50xi32>
      %23 = tpu.iota {dimensions = array<i32: 1>} : vector<32x50xi32>
      %c0_i32_18 = arith.constant 0 : i32
      %24 = vector.broadcast %c0_i32_18 : i32 to vector<32x50xi32>
      %c0_i32_19 = arith.constant 0 : i32
      %25 = vector.broadcast %c0_i32_19 : i32 to vector<32x50xi32>
      %c8_i32 = arith.constant 8 : i32
      %26 = vector.broadcast %c8_i32 : i32 to vector<32x50xi32>
      %27 = arith.cmpi sge, %22, %26 : vector<32x50xi32>
      %28 = arith.extui %27 : vector<32x50xi1> to vector<32x50xi32>
      %29 = arith.addi %24, %28 : vector<32x50xi32>
      %c1_i32_20 = arith.constant 1 : i32
      %30 = vector.broadcast %c1_i32_20 : i32 to vector<32x50xi32>
      %31 = arith.cmpi sge, %23, %30 : vector<32x50xi32>
      %32 = arith.extui %31 : vector<32x50xi1> to vector<32x50xi32>
      %33 = arith.addi %25, %32 : vector<32x50xi32>
      %c16_i32 = arith.constant 16 : i32
      %34 = vector.broadcast %c16_i32 : i32 to vector<32x50xi32>
      %35 = arith.cmpi sge, %22, %34 : vector<32x50xi32>
      %36 = arith.extui %35 : vector<32x50xi1> to vector<32x50xi32>
      %37 = arith.addi %29, %36 : vector<32x50xi32>
      %c5_i32 = arith.constant 5 : i32
      %38 = vector.broadcast %c5_i32 : i32 to vector<32x50xi32>
      %39 = arith.cmpi sge, %23, %38 : vector<32x50xi32>
      %40 = arith.extui %39 : vector<32x50xi1> to vector<32x50xi32>
      %41 = arith.addi %33, %40 : vector<32x50xi32>
      %c24_i32 = arith.constant 24 : i32
      %42 = vector.broadcast %c24_i32 : i32 to vector<32x50xi32>
      %43 = arith.cmpi sge, %22, %42 : vector<32x50xi32>
      %44 = arith.extui %43 : vector<32x50xi1> to vector<32x50xi32>
      %45 = arith.addi %37, %44 : vector<32x50xi32>
      %c14_i32 = arith.constant 14 : i32
      %46 = vector.broadcast %c14_i32 : i32 to vector<32x50xi32>
      %47 = arith.cmpi sge, %23, %46 : vector<32x50xi32>
      %48 = arith.extui %47 : vector<32x50xi1> to vector<32x50xi32>
      %49 = arith.addi %41, %48 : vector<32x50xi32>
      %50 = arith.cmpi eq, %45, %49 : vector<32x50xi32>
      %cst_21 = arith.constant 0.000000e+00 : f32
      %51 = vector.broadcast %cst_21 : f32 to vector<32x50xf32>
      %52 = arith.select %50, %21, %51 : vector<32x50xi1>, vector<32x50xf32>
      %53 = arith.truncf %52 : vector<32x50xf32> to vector<32x50xbf16>
      %c0_22 = arith.constant 0 : index
      %c0_23 = arith.constant 0 : index
      %c0_24 = arith.constant 0 : index
      %54 = vector.load %arg6[%c0_22, %c0_23, %c0_24] : memref<1x32x50xbf16, #tpu.memory_space<vmem>>, vector<1x32x50xbf16>
      %55 = vector.shape_cast %54 : vector<1x32x50xbf16> to vector<32x50xbf16>
      %56 = vector.shape_cast %53 : vector<32x50xbf16> to vector<1x32x50xbf16>
      tpu.vector_store %arg6[%c0_22, %c0_23, %c0_24], %56 {strides = array<i32>} : memref<1x32x50xbf16, #tpu.memory_space<vmem>>, vector<1x32x50xbf16>,
    } else {
    }
    return
  }
  func.func @transform_0(%arg0: i32, %arg1: i32) -> (i32, i32, i32) {
    %c0_i32 = arith.constant 0 : i32
    %c0_i32_0 = arith.constant 0 : i32
    return %arg0, %c0_i32, %arg1 : i32, i32, i32
  }
  func.func @transform_1(%arg0: i32, %arg1: i32) -> (i32, i32) {
    %c0_i32 = arith.constant 0 : i32
    %c0_i32_0 = arith.constant 0 : i32
    return %arg1, %c0_i32 : i32, i32
  }
  func.func @transform_2(%arg0: i32, %arg1: i32) -> (i32, i32) {
    %c0_i32 = arith.constant 0 : i32
    %c0_i32_0 = arith.constant 0 : i32
    %c0_i32_1 = arith.constant 0 : i32
    return %c0_i32, %c0_i32_0 : i32, i32
  }
  func.func @transform_3(%arg0: i32, %arg1: i32) -> (i32, i32) {
    %c0_i32 = arith.constant 0 : i32
    %c0_i32_0 = arith.constant 0 : i32
    %c0_i32_1 = arith.constant 0 : i32
    return %c0_i32, %c0_i32_0 : i32, i32
  }
  func.func @transform_4(%arg0: i32, %arg1: i32) -> (i32, i32, i32) {
    %c0_i32 = arith.constant 0 : i32
    %c0_i32_0 = arith.constant 0 : i32
    %c0_i32_1 = arith.constant 0 : i32
    return %arg0, %c0_i32, %c0_i32_0 : i32, i32, i32
  }
}

</mosaic_0001>

<bundles_post_ra>
// kernel: tpu_custom_call.1
= control target key start
LH: loop header
LB: loop body
LE: loop exit
PB: predicated region body
PF: predicated region fallthrough
CT: control target
= control target key end

     0   :  { %s1199_s0 = inlined_call_operand.vmem [shape: bf16[2,32,256], index: 0, kind: input, shape index: {}]   ;;  %s1200_s1 = inlined_call_operand.vmem [shape: bf16[256,50], index: 1, kind: input, shape index: {}]   ;;  %s1201_s2 = inlined_call_operand.vmem [shape: bf16[32,32], index: 2, kind: input, shape index: {}]   ;;  %s1202_s3 = inlined_call_operand.vmem [shape: f32[32,1], index: 3, kind: input, shape index: {}]   ;;  %s1203_s4 = inlined_call_operand.hbm [shape: bf16[2,32,50], index: 4, kind: output, shape index: {}]  }
   0x1   :  { %1204 = sst [smem:[#allocation7_spill]] %s1199_s0 }
   0x2   :  { %1205 = sst [smem:[#allocation8_spill]] %s1200_s1 }
   0x3   :  { %9 = vsyncpa [#allocation5], 0 }
   0x4   :  { %11 = vsyncpa [#allocation5 + $0x1], 0  ;;  %s992_s15 = smov 0   ;;  %s994_s16 = smov 0  }
   0x5   :  { %s996_s17 = smov 0   ;;  %s998_s18 = smov 0  }
   0x6   :  { %s1000_s19 = smov 0   ;;  %s1002_s20 = smov 0  }
   0x7   :  { %s1004_s21 = smov 0   ;;  %s1006_s22 = smov 0  }
   0x8   :  { %s1008_s23 = smov 0   ;;  %s1010_s24 = smov 0  }
   0x9 LB: > { %s662_s25 = sadd.s32 4294967295, %s961_s24   ;;  %s663_s26 = sadd.s32 4294967294, %s961_s24   ;;  %s961_s24 = sphi %s1010_s24, %s17_s24   ;;  %s957_s23 = sphi %s1008_s23, %s1219_s23   ;;  %s953_s22 = sphi %s1006_s22, %s1218_s22   ;;  %s949_s21 = sphi %s1004_s21, %s1217_s21   ;;  %s945_s20 = sphi %s1002_s20, %s1216_s20   ;;  %s941_s19 = sphi %s1000_s19, %s1215_s19   ;;  %s937_s18 = sphi %s998_s18, %s1214_s18   ;;  %s933_s17 = sphi %s996_s17, %s1213_s17   ;;  %s929_s16 = sphi %s994_s16, %s1212_s16   ;;  %s925_s15 = sphi %s992_s15, %s1211_s15  }
   0xa   : > { %s26_s27 = sadd.s32 1, %s953_s22  ;;  %s29_s28 = sadd.s32 1, %s957_s23 }
   0xb   : > { %p27_p0 = scmp.ge.s32.totalorder %s26_s27, 2  ;;  %s38_s29 = sadd.s32 1, %s941_s19 }
   0xc   : > { %p45_p1 = scmp.ne.s32.totalorder %s941_s19, %s937_s18  ;;  %p46_p2 = scmp.eq.s32.totalorder %s961_s24, 0 }
   0xd   : > { %s1221_s27 = smov (%p27_p0, %s26_s27), 0  ;;  %s1223_s28 = smov (!%p27_p0, %s29_s28), %s957_s23 }
   0xe   : > { %s34_s30 = ssub.s32 %s953_s22, %s1221_s27  ;;  %p1055_p3 = por %p46_p2, %p45_p1 }
   0xf   : > { %p31_p4 = scmp.ge.s32.totalorder %s1223_s28, 2  ;;  %s132_s6 = sadd.s32 1, %s933_s17 }
  0x10   : > { %p142_p5 = scmp.ne.s32.totalorder %s933_s17, %s929_s16  ;;  %p143_p6 = scmp.eq.s32.totalorder %s662_s25, 3 }
  0x11   : > { %s1225_s28 = smov (%p31_p4, %s1223_s28), 0  ;;  %p148_p8 = scmp.ne.s32.totalorder %s929_s16, %s925_s15 }
  0x12   : > { %p1064_p7 = por %p143_p6, %p142_p5  ;;  %s33_s8 = ssub.s32 %s957_s23, %s1225_s28 }
  0x13   : > { %p149_p9 = scmp.eq.s32.totalorder %s663_s26, 3  ;;  %s35_s9 = sor.u32 %s34_s30, %s33_s8 }
  0x14   : > { %p130_p10 = scmp.eq.s32.totalorder %s33_s8, 0  ;;  %p36_p11 = scmp.eq.s32.totalorder %s35_s9, 0 }
  0x15   : > { %p1072_p12 = por %p149_p9, %p148_p8  ;;  %p665_p13 = scmp.ge.s32.totalorder %s961_s24, 4 }
  0x16   : > { %s1077_s11 = scalar_select %p130_p10, %s933_s17, %s132_s6  }
  0x17   : > { %s1080_s12 = scalar_select %p36_p11, %s941_s19, %s38_s29  }
  0x18   : > { %171 = sbr.rel (%p665_p13) target bundleno = 43 (0x2b), region = 24 }
  0x1d   : > { %174 = sbr.rel (!%p1055_p3) target bundleno = 43 (0x2b), region = 28  ;;  %s176_s13 = sand.u32 (%p1055_p3), 1, %s941_s19  }
  0x1e   : > { %s667_s14 = sshll.u32 (%p1055_p3), %s957_s23, 3  ;;  %s666_s25 = sshll.u32 (%p1055_p3), %s176_s13, 4 }
  0x1f   : > { %s180_s26 = sadd.s32 (%p1055_p3), %s953_s22, %s667_s14  ;;  %s1209_s0 = sld [smem:[#allocation7_spill]] (%p1055_p3) }
  0x20   : > { %s668_s30 = sshll.u32 (%p1055_p3), %s180_s26, 2  ;;  %s178_s29 = scalar_lea.vmem (%p1055_p3), [#allocation3], %s666_s25 }
  0x25   : > { %s182_s6 = scalar_lea.vmem %s1209_s0, %s668_s30 }
  0x26   : > { %v199_v0 = vld [vmem:[%s182_s6] sm:$0xf]  ;;  %v201_v1 = vld [vmem:[%s182_s6 + $0x8] sm:$0xf]  ;;  %v203_v2 = vld [vmem:[%s182_s6 + $0x10] sm:$0xf] }
  0x27   : > { %200 = vst [vmem:[%s178_s29] sm:$0xf] %v199_v0  ;;  %v205_v3 = vld [vmem:[%s182_s6 + $0x18] sm:$0xf] }
  0x28   : > { %202 = vst [vmem:[%s178_s29 + $0x4] sm:$0xf] %v201_v1 }
  0x29   : > { %204 = vst [vmem:[%s178_s29 + $0x8] sm:$0xf] %v203_v2 }
  0x2a   : > { %206 = vst [vmem:[%s178_s29 + $0xc] sm:$0xf] %v205_v3 }
  0x2b PF: > { %p669_p0 = scmp.ge.s32.totalorder %s961_s24, 1  ;;  %p246_p1 = scmp.lt.s32.totalorder %s961_s24, 5 }
  0x2d   : > { %p247_p2 = pnand %p669_p0, %p246_p1 }
  0x2e   : > { %s253_s5 = sand.u32 (!%p247_p2), 1, %s937_s18   ;;  %s280_s13 = sand.u32 (!%p247_p2), 1, %s929_s16  }
  0x2f   : > { %250 = sbr.rel (%p247_p2) target bundleno = 408 (0x198), region = 73  ;;  %s1095_s14 = sshll.u32 (!%p247_p2), %s253_s5, 4 }
  0x30   : > { %s671_s25 = sshll.u32 (!%p247_p2), %s280_s13, 4  ;;  %s672_s26 = sshll.u32 (!%p247_p2), %s945_s20, 4 }
  0x31   : > { %p284_p3 = scmp.lt.s32.totalorder (!%p247_p2), %s672_s26, 31  ;;  %s1210_s1 = sld [smem:[#allocation8_spill]] (!%p247_p2) }
  0x32   : > { %s255_s29 = scalar_lea.vmem (!%p247_p2), [#allocation3], %s1095_s14  ;;  %s1106_s0 = scalar_lea.vmem (!%p247_p2), [#allocation4], %s671_s25 }
  0x33   : > { %p674_p4 = scmp.ne.s32.totalorder (!%p247_p2), %s945_s20, 0 }
  0x34   : > { %s1227_s26 = smov (!%p284_p3, %s672_s26), 31 }
  0x35   : > { %s673_s30 = sshll.u32 %s1227_s26, 2  ;;  %293 = sbr.rel (%p674_p4) target bundleno = 63 (0x3f), region = 81 }
  0x37   : > { %s1103_s6 = scalar_lea.vmem %s1210_s1, %s673_s30 }
  0x3a   : > { %vm294_vm0 = vcmask 408576   ;;  %v963_v4 = vmov 0.0  }
  0x3b   : > { %295 = vst.msk [vmem:[#allocation2] sm:$0xff] %vm294_vm0, %v963_v4 }
  0x3c   : > { %296 = vst.msk [vmem:[#allocation2 + $0x8] sm:$0xff] %vm294_vm0, %v963_v4 }
  0x3d   : > { %297 = vst.msk [vmem:[#allocation2 + $0x10] sm:$0xff] %vm294_vm0, %v963_v4 }
  0x3e   : > { %298 = vst.msk [vmem:[#allocation2 + $0x18] sm:$0xff] %vm294_vm0, %v963_v4 }
  0x3f PF: > { %v744_v5 = vld [vmem:[%s1103_s6 + $0x38] sm:$0xff]  ;;  %v743_v6 = vld [vmem:[%s1103_s6 + $0x30] sm:$0xff]  ;;  %v742_v7 = vld [vmem:[%s1103_s6 + $0x28] sm:$0xff]  ;;  %vm406_vm1 = vcmask 408576   ;;  %p715_p5 = scmp.ne.s32.totalorder %s945_s20, 1 }
  0x40   : > { %383 = vmatpush.bf16.msra.mxu0 %v744_v5  ;;  %748 = vmatpush.bf16.msra.mxu1 %v744_v5  ;;  %v741_v8 = vld [vmem:[%s1103_s6 + $0x20] sm:$0xff]  ;;  %v740_v9 = vld [vmem:[%s1103_s6 + $0x18] sm:$0xff]  ;;  %v739_v10 = vld [vmem:[%s1103_s6 + $0x10] sm:$0xff] }
  0x41   : > { %v738_v11 = vld [vmem:[%s1103_s6 + $0x8] sm:$0xff]  ;;  %v737_v12 = vld [vmem:[%s1103_s6] sm:$0xff] }
  0x42   : > { %v735_v13 = vld [vmem:[%s255_s29] sm:$0xff]  ;;  %v736_v14 = vld [vmem:[%s255_s29 + $0x8] sm:$0xff] }
  0x43   : > { %v299_v15 = vld [vmem:[#allocation2] sm:$0xff]  ;;  %v300_v21 = vld [vmem:[#allocation2 + $0x8] sm:$0xff] }
  0x44   : > { %384 = vmatpush.bf16.msra.mxu0 %v743_v6  ;;  %749 = vmatpush.bf16.msra.mxu1 %v743_v6  ;;  %v301_v16 = vld [vmem:[#allocation2 + $0x10] sm:$0xff] }
  0x45   : > { %v302_v22 = vld [vmem:[#allocation2 + $0x18] sm:$0xff] }
  0x48   : > { %385 = vmatpush.bf16.msra.mxu0 %v742_v7  ;;  %750 = vmatpush.bf16.msra.mxu1 %v742_v7 }
  0x4c   : > { %386 = vmatpush.bf16.msra.mxu0 %v741_v8  ;;  %751 = vmatpush.bf16.msra.mxu1 %v741_v8 }
  0x50   : > { %387 = vmatpush.bf16.msra.mxu0 %v740_v9  ;;  %752 = vmatpush.bf16.msra.mxu1 %v740_v9 }
  0x54   : > { %388 = vmatpush.bf16.msra.mxu0 %v739_v10  ;;  %753 = vmatpush.bf16.msra.mxu1 %v739_v10 }
  0x58   : > { %389 = vmatpush.bf16.msra.mxu0 %v738_v11  ;;  %754 = vmatpush.bf16.msra.mxu1 %v738_v11 }
  0x5c   : > { %390 = vmatpush.bf16.msra.mxu0 %v737_v12  ;;  %755 = vmatpush.bf16.msra.mxu1 %v737_v12 }
  0x5f   : > { %391 = vmatmul.bf16.vlgmr.msra.gmra.mxu0 %v735_v13  ;;  %396 = vmatmul.bf16.vlgmr.msra.gmra.mxu1 %v736_v14 }
  0xdc   : > { %v392_v17 = vpop.f32.mrf.mxu0  ;;  %v397_v18 = vpop.f32.mrf.mxu1 }
  0xdd   : > { %v402_v19 = vadd.f32 %v392_v17, %v299_v15  ;;  %v404_v20 = vadd.f32 %v397_v18, %v301_v16 }
  0xdf   : > { %407 = vst.msk [vmem:[#allocation2] sm:$0xff] %vm406_vm1, %v402_v19 }
  0xe0   : > { %409 = vst.msk [vmem:[#allocation2 + $0x10] sm:$0xff] %vm406_vm1, %v404_v20 }
  0xe4   : > { %v394_v23 = vpop.f32.mrf.mxu0  ;;  %v399_v24 = vpop.f32.mrf.mxu1  ;;  %414 = sbr.rel (%p715_p5) target bundleno = 392 (0x188), region = 85 }
  0xe5   : > { %v403_v25 = vadd.f32 %v394_v23, %v300_v21  ;;  %v405_v26 = vadd.f32 %v399_v24, %v302_v22 }
  0xe7   : > { %408 = vst.msk [vmem:[#allocation2 + $0x8] sm:$0xff] %vm406_vm1, %v403_v25 }
  0xe8   : > { %410 = vst.msk [vmem:[#allocation2 + $0x18] sm:$0xff] %vm406_vm1, %v405_v26 }
  0xe9   : > { %v417_v27 = vld [vmem:[#allocation2 + $0x10] sm:$0xff]  ;;  %v415_v29 = vld [vmem:[#allocation2] sm:$0xff]  ;;  %v964_v32 = vmov 0   ;;  %v746_v37 = vld [vmem:[%s1201_s2 + $0x8] sm:$0xff]  ;;  %vm459_vm2 = vcmask 261120   ;;  %v494_v40 = vlaneseq  ;;  %vm548_vm8 = vcmask 404480  }
  0xea   : > { %850 = vset.pattern.permute.xlu1 %v964_v32  ;;  %849 = vset.pattern.permute.xlu0 %v964_v32  ;;  %v427_v33 = vld [vmem:[%s1202_s3 + $0x10] sm:$0xff]  ;;  %v425_v34 = vld [vmem:[%s1202_s3] sm:$0xff]  ;;  %v428_v38 = vld [vmem:[%s1202_s3 + $0x18] sm:$0xff] }
  0xeb   : > { %441 = vperm.xlu1 %850, %v427_v33   ;;  %431 = vperm.xlu0 %849, %v425_v34   ;;  %v745_v36 = vld [vmem:[%s1201_s2] sm:$0xff]  ;;  %v426_v39 = vld [vmem:[%s1202_s3 + $0x8] sm:$0xff]  ;;  %v495_v41 = vand.u32 127, %v494_v40 }
  0xed   : > { %vm504_vm3 = vcmp.ge.s32.totalorder %v495_v41, 1  ;;  %vm518_vm4 = vcmp.ge.s32.totalorder %v495_v41, 5  ;;  %vm533_vm5 = vcmp.ge.s32.totalorder %v495_v41, 14 }
  0xee   : > { %v416_v31 = vld [vmem:[#allocation2 + $0x8] sm:$0xff]  ;;  %v505_v42 = vsel %vm504_vm3, 1, %v964_v32  ;;  %v519_v43 = vsel %vm518_vm4, 1, %v964_v32  ;;  %v534_v45 = vsel %vm533_vm5, 1, %v964_v32 }
  0xef   : > { %v418_v28 = vld [vmem:[#allocation2 + $0x18] sm:$0xff]  ;;  %v419_v35 = vpack.c.bf16 %v416_v31, %v415_v29  ;;  %v520_v44 = vadd.s32 %v519_v43, %v505_v42 }
  0xf0   : > { %v420_v30 = vpack.c.bf16 %v418_v28, %v417_v27 }
  0xf1   : > { %v535_v48 = vadd.s32 %v534_v45, %v520_v44 }
  0xf2   : > { %472 = vmatpush.bf16.msra.mxu0 %v420_v30  ;;  %756 = vmatpush.bf16.msra.mxu1 %v420_v30 }
  0xf3   : > { %446 = vperm.xlu1 %850, %v428_v38   ;;  %436 = vperm.xlu0 %849, %v426_v39   ;;  %vm726_vm6 = vcmp.eq.s32.totalorder %v535_v48, 0  ;;  %vm728_vm7 = vcmp.eq.s32.totalorder %v535_v48, 2  ;;  %vm727_vm9 = vcmp.eq.s32.totalorder %v535_v48, 1  ;;  %vm729_vm10 = vcmp.eq.s32.totalorder %v535_v48, 3 }
  0xf6   : > { %473 = vmatpush.bf16.msra.mxu0 %v419_v35  ;;  %757 = vmatpush.bf16.msra.mxu1 %v419_v35 }
  0xf9   : > { %724 = vmatmul.msk.bf16.vlgmr.msra.gmra.mxu0 %vm459_vm2, %v745_v36  ;;  %725 = vmatmul.msk.bf16.vlgmr.msra.gmra.mxu1 %vm459_vm2, %v746_v37 }
 0x15d   : > { %v442_v46 = vpop.permute.xlu1 %441  ;;  %v432_v47 = vpop.permute.xlu0 %431 }
 0x165   : > { %v447_v59 = vpop.permute.xlu1 %446  ;;  %v437_v60 = vpop.permute.xlu0 %436 }
 0x176   : > { %v475_v49 = vpop.f32.mrf.mxu0  ;;  %v480_v50 = vpop.f32.mrf.mxu1 }
 0x177   : > { %v476_v51 = vadd.f32 %v475_v49, %v432_v47  ;;  %v481_v52 = vadd.f32 %v480_v50, %v442_v46 }
 0x179   : > { %v485_v53 = vmax.f32 %v476_v51, 0.0  ;;  %v487_v54 = vmax.f32 %v481_v52, 0.0 }
 0x17b   : > { %v540_v55 = vsel %vm726_vm6, %v485_v53, 0.0  ;;  %v542_v56 = vsel %vm728_vm7, %v487_v54, 0.0 }
 0x17c   : > { %v544_v57 = vpack.c.bf16 %v540_v55, %v540_v55  ;;  %v546_v58 = vpack.c.bf16 %v542_v56, %v542_v56 }
 0x17e   : > { %549 = vst.msk [vmem:[%s1106_s0] sm:$0xf] %vm548_vm8, %v544_v57  ;;  %v477_v61 = vpop.f32.mrf.mxu0  ;;  %v482_v62 = vpop.f32.mrf.mxu1 }
 0x17f   : > { %551 = vst.msk [vmem:[%s1106_s0 + $0x8] sm:$0xf] %vm548_vm8, %v546_v58  ;;  %v478_v63 = vadd.f32 %v477_v61, %v437_v60  ;;  %v483_v0 = vadd.f32 %v482_v62, %v447_v59 }
 0x181   : > { %v486_v1 = vmax.f32 %v478_v63, 0.0  ;;  %v488_v2 = vmax.f32 %v483_v0, 0.0 }
 0x183   : > { %v541_v3 = vsel %vm727_vm9, %v486_v1, 0.0  ;;  %v543_v4 = vsel %vm729_vm10, %v488_v2, 0.0 }
 0x184   : > { %v545_v5 = vpack.c.bf16 %v541_v3, %v541_v3  ;;  %v547_v6 = vpack.c.bf16 %v543_v4, %v543_v4 }
 0x186   : > { %550 = vst.msk [vmem:[%s1106_s0 + $0x4] sm:$0xf] %vm548_vm8, %v545_v5 }
 0x187   : > { %552 = vst.msk [vmem:[%s1106_s0 + $0xc] sm:$0xf] %vm548_vm8, %v547_v6 }
 0x188 PF: > { %s747_s5 = sshll.u32 %s949_s21, 4  ;;  %s566_s26 = sshll.u32 %s1106_s0, 4  ;;  %s567_s26 = int_to_ptr.vmem [resolvable:$true] %s566_s26 }
 0x189   : > { %s565_s20 = scalar_lea.hbm %s1203_s4, %s747_s5  ;;  %s554_s8 = scalar_lea.sflag [#allocation5], %s280_s13 }
 0x18a   : > { %s568_s30 = sshll.u32 %s565_s20, 4  ;;  %s871_s21 = scalar_lea.hbm %s1203_s4, 32  ;;  %s569_s30 = int_to_ptr.hbm [resolvable:$true] %s568_s30 }
 0x18b   : > { %s865_s9 = sshra.s32 %s569_s30, 4  ;;  %s866_s9 = int_to_ptr.hbm [resolvable:$true] %s865_s9 }
 0x18c   : > { %s867_s6 = scalar_lea.hbm %s866_s9, 16  ;;  %p872_p10 = scmp.lt.s32.totalorder %s866_s9, %s1203_s4 }
 0x18d   : > { %p868_p6 = scmp.ne.s32.totalorder %s866_s9, %s867_s6  ;;  %p873_p11 = scmp.lt.s32.totalorder %s871_s21, %s867_s6 }
 0x18f   : > { %p869_p8 = pnand %p868_p6, %p1064_p7  ;;  %p874_p13 = por %p873_p11, %p872_p10 }
 0x191   : > { %p870_p9 = pneg %p869_p8 }
 0x193   : > { %p875_p0 = pnand %p874_p13, %p870_p9 }
 0x195   : > { %878 = shalt.err (!%p875_p0)
}
 0x196   : > { %s965_s0 = smov 64   ;;  %s966_s13 = smov 4  }
 0x197   : > { %758 = dma.vmem_to_hbm [thread:$0]  (%p1064_p7), %s567_s26, 256, %s569_s30, %s554_s8, %s965_s0, %s965_s0, %s966_s13  }
 0x198 PF: > { %p764_p1 = scmp.ge.s32.totalorder %s961_s24, 2  ;;  %s583_s5 = sand.u32 1, %s925_s15  }
 0x199   : > { %s584_s1 = scalar_lea.sflag [#allocation5], %s583_s5 }
 0x19a   : > { %p761_p2 = pnand %p764_p1, %p1072_p12 }
 0x19c   : > { %p762_p3 = pneg %p761_p2 }
 0x19e   : > { %920 = dma.done.wait (%p762_p3), %s584_s1, 256  }
 0x19f   : > { %922 = vsyncadd (%p762_p3), %s584_s1, 4294967040  ;;  %s17_s24 = sadd.s32 1, %s961_s24   ;;  %s1211_s15 = smov %s929_s16 }
 0x1a0   : > { %p14_p4 = scmp.ge.s32.totalorder %s17_s24, 6   ;;  %s1212_s16 = smov %s933_s17 }
 0x1a1   : > { %s1213_s17 = smov %s1077_s11  ;;  %s1214_s18 = smov %s941_s19 }
 0x1a2   : > { %s1215_s19 = smov %s1080_s12  ;;  %s1216_s20 = smov %s953_s22 }
 0x1a3   : > { %s1217_s21 = smov %s957_s23  ;;  %s1218_s22 = smov %s1221_s27 }
 0x1a4   : > { %s1219_s23 = smov %s1225_s28  ;;  %16 = sbr.rel (!%p14_p4) target bundleno = 9 (0x9), region = 128 }
 0x1a9   :  { %590 = vsyncpa [#allocation5], 1 }
 0x1aa   :  { %592 = vsyncpa [#allocation5 + $0x1], 1 }

// kernel: tpu_custom_call.1
= control target key start
LH: loop header
LB: loop body
LE: loop exit
PB: predicated region body
PF: predicated region fallthrough
CT: control target
= control target key end

     0   :  { %s1199_s0 = inlined_call_operand.vmem [shape: bf16[2,32,256], index: 0, kind: input, shape index: {}]   ;;  %s1200_s1 = inlined_call_operand.vmem [shape: bf16[256,50], index: 1, kind: input, shape index: {}]   ;;  %s1201_s2 = inlined_call_operand.vmem [shape: bf16[32,32], index: 2, kind: input, shape index: {}]   ;;  %s1202_s3 = inlined_call_operand.vmem [shape: f32[32,1], index: 3, kind: input, shape index: {}]   ;;  %s1203_s4 = inlined_call_operand.hbm [shape: bf16[2,32,50], index: 4, kind: output, shape index: {}]  }
   0x1   :  { %1204 = sst [smem:[#allocation7_spill]] %s1199_s0 }
   0x2   :  { %1205 = sst [smem:[#allocation8_spill]] %s1200_s1 }
   0x3   :  { %9 = vsyncpa [#allocation5], 0 }
   0x4   :  { %11 = vsyncpa [#allocation5 + $0x1], 0  ;;  %s992_s15 = smov 0   ;;  %s994_s16 = smov 0  }
   0x5   :  { %s996_s17 = smov 0   ;;  %s998_s18 = smov 0  }
   0x6   :  { %s1000_s19 = smov 0   ;;  %s1002_s20 = smov 0  }
   0x7   :  { %s1004_s21 = smov 0   ;;  %s1006_s22 = smov 0  }
   0x8   :  { %s1008_s23 = smov 0   ;;  %s1010_s24 = smov 0  }
   0x9 LB: > { %s662_s25 = sadd.s32 4294967295, %s961_s24   ;;  %s663_s26 = sadd.s32 4294967294, %s961_s24   ;;  %s961_s24 = sphi %s1010_s24, %s17_s24   ;;  %s957_s23 = sphi %s1008_s23, %s1219_s23   ;;  %s953_s22 = sphi %s1006_s22, %s1218_s22   ;;  %s949_s21 = sphi %s1004_s21, %s1217_s21   ;;  %s945_s20 = sphi %s1002_s20, %s1216_s20   ;;  %s941_s19 = sphi %s1000_s19, %s1215_s19   ;;  %s937_s18 = sphi %s998_s18, %s1214_s18   ;;  %s933_s17 = sphi %s996_s17, %s1213_s17   ;;  %s929_s16 = sphi %s994_s16, %s1212_s16   ;;  %s925_s15 = sphi %s992_s15, %s1211_s15  }
   0xa   : > { %s26_s27 = sadd.s32 1, %s953_s22  ;;  %s29_s28 = sadd.s32 1, %s957_s23 }
   0xb   : > { %p27_p0 = scmp.ge.s32.totalorder %s26_s27, 2  ;;  %s38_s29 = sadd.s32 1, %s941_s19 }
   0xc   : > { %p45_p1 = scmp.ne.s32.totalorder %s941_s19, %s937_s18  ;;  %p46_p2 = scmp.eq.s32.totalorder %s961_s24, 0 }
   0xd   : > { %s1221_s27 = smov (%p27_p0, %s26_s27), 0  ;;  %s1223_s28 = smov (!%p27_p0, %s29_s28), %s957_s23 }
   0xe   : > { %s34_s30 = ssub.s32 %s953_s22, %s1221_s27  ;;  %p1055_p3 = por %p46_p2, %p45_p1 }
   0xf   : > { %p31_p4 = scmp.ge.s32.totalorder %s1223_s28, 2  ;;  %s132_s6 = sadd.s32 1, %s933_s17 }
  0x10   : > { %p142_p5 = scmp.ne.s32.totalorder %s933_s17, %s929_s16  ;;  %p143_p6 = scmp.eq.s32.totalorder %s662_s25, 3 }
  0x11   : > { %s1225_s28 = smov (%p31_p4, %s1223_s28), 0  ;;  %p148_p8 = scmp.ne.s32.totalorder %s929_s16, %s925_s15 }
  0x12   : > { %p1064_p7 = por %p143_p6, %p142_p5  ;;  %s33_s8 = ssub.s32 %s957_s23, %s1225_s28 }
  0x13   : > { %p149_p9 = scmp.eq.s32.totalorder %s663_s26, 3  ;;  %s35_s9 = sor.u32 %s34_s30, %s33_s8 }
  0x14   : > { %p130_p10 = scmp.eq.s32.totalorder %s33_s8, 0  ;;  %p36_p11 = scmp.eq.s32.totalorder %s35_s9, 0 }
  0x15   : > { %p1072_p12 = por %p149_p9, %p148_p8  ;;  %p665_p13 = scmp.ge.s32.totalorder %s961_s24, 4 }
  0x16   : > { %s1077_s11 = scalar_select %p130_p10, %s933_s17, %s132_s6  }
  0x17   : > { %s1080_s12 = scalar_select %p36_p11, %s941_s19, %s38_s29  }
  0x18   : > { %171 = sbr.rel (%p665_p13) target bundleno = 43 (0x2b), region = 24 }
  0x1d   : > { %174 = sbr.rel (!%p1055_p3) target bundleno = 43 (0x2b), region = 28  ;;  %s176_s13 = sand.u32 (%p1055_p3), 1, %s941_s19  }
  0x1e   : > { %s667_s14 = sshll.u32 (%p1055_p3), %s957_s23, 3  ;;  %s666_s25 = sshll.u32 (%p1055_p3), %s176_s13, 4 }
  0x1f   : > { %s180_s26 = sadd.s32 (%p1055_p3), %s953_s22, %s667_s14  ;;  %s1209_s0 = sld [smem:[#allocation7_spill]] (%p1055_p3) }
  0x20   : > { %s668_s30 = sshll.u32 (%p1055_p3), %s180_s26, 2  ;;  %s178_s29 = scalar_lea.vmem (%p1055_p3), [#allocation3], %s666_s25 }
  0x25   : > { %s182_s6 = scalar_lea.vmem %s1209_s0, %s668_s30 }
  0x26   : > { %v199_v0 = vld [vmem:[%s182_s6] sm:$0xf]  ;;  %v201_v1 = vld [vmem:[%s182_s6 + $0x8] sm:$0xf]  ;;  %v203_v2 = vld [vmem:[%s182_s6 + $0x10] sm:$0xf] }
  0x27   : > { %200 = vst [vmem:[%s178_s29] sm:$0xf] %v199_v0  ;;  %v205_v3 = vld [vmem:[%s182_s6 + $0x18] sm:$0xf] }
  0x28   : > { %202 = vst [vmem:[%s178_s29 + $0x4] sm:$0xf] %v201_v1 }
  0x29   : > { %204 = vst [vmem:[%s178_s29 + $0x8] sm:$0xf] %v203_v2 }
  0x2a   : > { %206 = vst [vmem:[%s178_s29 + $0xc] sm:$0xf] %v205_v3 }
  0x2b PF: > { %p669_p0 = scmp.ge.s32.totalorder %s961_s24, 1  ;;  %p246_p1 = scmp.lt.s32.totalorder %s961_s24, 5 }
  0x2d   : > { %p247_p2 = pnand %p669_p0, %p246_p1 }
  0x2e   : > { %s253_s5 = sand.u32 (!%p247_p2), 1, %s937_s18   ;;  %s280_s13 = sand.u32 (!%p247_p2), 1, %s929_s16  }
  0x2f   : > { %250 = sbr.rel (%p247_p2) target bundleno = 408 (0x198), region = 73  ;;  %s1095_s14 = sshll.u32 (!%p247_p2), %s253_s5, 4 }
  0x30   : > { %s671_s25 = sshll.u32 (!%p247_p2), %s280_s13, 4  ;;  %s672_s26 = sshll.u32 (!%p247_p2), %s945_s20, 4 }
  0x31   : > { %p284_p3 = scmp.lt.s32.totalorder (!%p247_p2), %s672_s26, 31  ;;  %s1210_s1 = sld [smem:[#allocation8_spill]] (!%p247_p2) }
  0x32   : > { %s255_s29 = scalar_lea.vmem (!%p247_p2), [#allocation3], %s1095_s14  ;;  %s1106_s0 = scalar_lea.vmem (!%p247_p2), [#allocation4], %s671_s25 }
  0x33   : > { %p674_p4 = scmp.ne.s32.totalorder (!%p247_p2), %s945_s20, 0 }
  0x34   : > { %s1227_s26 = smov (!%p284_p3, %s672_s26), 31 }
  0x35   : > { %s673_s30 = sshll.u32 %s1227_s26, 2  ;;  %293 = sbr.rel (%p674_p4) target bundleno = 63 (0x3f), region = 81 }
  0x37   : > { %s1103_s6 = scalar_lea.vmem %s1210_s1, %s673_s30 }
  0x3a   : > { %vm294_vm0 = vcmask 408576   ;;  %v963_v4 = vmov 0.0  }
  0x3b   : > { %295 = vst.msk [vmem:[#allocation2] sm:$0xff] %vm294_vm0, %v963_v4 }
  0x3c   : > { %296 = vst.msk [vmem:[#allocation2 + $0x8] sm:$0xff] %vm294_vm0, %v963_v4 }
  0x3d   : > { %297 = vst.msk [vmem:[#allocation2 + $0x10] sm:$0xff] %vm294_vm0, %v963_v4 }
  0x3e   : > { %298 = vst.msk [vmem:[#allocation2 + $0x18] sm:$0xff] %vm294_vm0, %v963_v4 }
  0x3f PF: > { %v744_v5 = vld [vmem:[%s1103_s6 + $0x38] sm:$0xff]  ;;  %v743_v6 = vld [vmem:[%s1103_s6 + $0x30] sm:$0xff]  ;;  %v742_v7 = vld [vmem:[%s1103_s6 + $0x28] sm:$0xff]  ;;  %vm406_vm1 = vcmask 408576   ;;  %p715_p5 = scmp.ne.s32.totalorder %s945_s20, 1 }
  0x40   : > { %383 = vmatpush.bf16.msra.mxu0 %v744_v5  ;;  %748 = vmatpush.bf16.msra.mxu1 %v744_v5  ;;  %v741_v8 = vld [vmem:[%s1103_s6 + $0x20] sm:$0xff]  ;;  %v740_v9 = vld [vmem:[%s1103_s6 + $0x18] sm:$0xff]  ;;  %v739_v10 = vld [vmem:[%s1103_s6 + $0x10] sm:$0xff] }
  0x41   : > { %v738_v11 = vld [vmem:[%s1103_s6 + $0x8] sm:$0xff]  ;;  %v737_v12 = vld [vmem:[%s1103_s6] sm:$0xff] }
  0x42   : > { %v735_v13 = vld [vmem:[%s255_s29] sm:$0xff]  ;;  %v736_v14 = vld [vmem:[%s255_s29 + $0x8] sm:$0xff] }
  0x43   : > { %v299_v15 = vld [vmem:[#allocation2] sm:$0xff]  ;;  %v300_v21 = vld [vmem:[#allocation2 + $0x8] sm:$0xff] }
  0x44   : > { %384 = vmatpush.bf16.msra.mxu0 %v743_v6  ;;  %749 = vmatpush.bf16.msra.mxu1 %v743_v6  ;;  %v301_v16 = vld [vmem:[#allocation2 + $0x10] sm:$0xff] }
  0x45   : > { %v302_v22 = vld [vmem:[#allocation2 + $0x18] sm:$0xff] }
  0x48   : > { %385 = vmatpush.bf16.msra.mxu0 %v742_v7  ;;  %750 = vmatpush.bf16.msra.mxu1 %v742_v7 }
  0x4c   : > { %386 = vmatpush.bf16.msra.mxu0 %v741_v8  ;;  %751 = vmatpush.bf16.msra.mxu1 %v741_v8 }
  0x50   : > { %387 = vmatpush.bf16.msra.mxu0 %v740_v9  ;;  %752 = vmatpush.bf16.msra.mxu1 %v740_v9 }
  0x54   : > { %388 = vmatpush.bf16.msra.mxu0 %v739_v10  ;;  %753 = vmatpush.bf16.msra.mxu1 %v739_v10 }
  0x58   : > { %389 = vmatpush.bf16.msra.mxu0 %v738_v11  ;;  %754 = vmatpush.bf16.msra.mxu1 %v738_v11 }
  0x5c   : > { %390 = vmatpush.bf16.msra.mxu0 %v737_v12  ;;  %755 = vmatpush.bf16.msra.mxu1 %v737_v12 }
  0x5f   : > { %391 = vmatmul.bf16.vlgmr.msra.gmra.mxu0 %v735_v13  ;;  %396 = vmatmul.bf16.vlgmr.msra.gmra.mxu1 %v736_v14 }
  0xdc   : > { %v392_v17 = vpop.f32.mrf.mxu0  ;;  %v397_v18 = vpop.f32.mrf.mxu1 }
  0xdd   : > { %v402_v19 = vadd.f32 %v392_v17, %v299_v15  ;;  %v404_v20 = vadd.f32 %v397_v18, %v301_v16 }
  0xdf   : > { %407 = vst.msk [vmem:[#allocation2] sm:$0xff] %vm406_vm1, %v402_v19 }
  0xe0   : > { %409 = vst.msk [vmem:[#allocation2 + $0x10] sm:$0xff] %vm406_vm1, %v404_v20 }
  0xe4   : > { %v394_v23 = vpop.f32.mrf.mxu0  ;;  %v399_v24 = vpop.f32.mrf.mxu1  ;;  %414 = sbr.rel (%p715_p5) target bundleno = 392 (0x188), region = 85 }
  0xe5   : > { %v403_v25 = vadd.f32 %v394_v23, %v300_v21  ;;  %v405_v26 = vadd.f32 %v399_v24, %v302_v22 }
  0xe7   : > { %408 = vst.msk [vmem:[#allocation2 + $0x8] sm:$0xff] %vm406_vm1, %v403_v25 }
  0xe8   : > { %410 = vst.msk [vmem:[#allocation2 + $0x18] sm:$0xff] %vm406_vm1, %v405_v26 }
  0xe9   : > { %v417_v27 = vld [vmem:[#allocation2 + $0x10] sm:$0xff]  ;;  %v415_v29 = vld [vmem:[#allocation2] sm:$0xff]  ;;  %v964_v32 = vmov 0   ;;  %v746_v37 = vld [vmem:[%s1201_s2 + $0x8] sm:$0xff]  ;;  %vm459_vm2 = vcmask 261120   ;;  %v494_v40 = vlaneseq  ;;  %vm548_vm8 = vcmask 404480  }
  0xea   : > { %850 = vset.pattern.permute.xlu1 %v964_v32  ;;  %849 = vset.pattern.permute.xlu0 %v964_v32  ;;  %v427_v33 = vld [vmem:[%s1202_s3 + $0x10] sm:$0xff]  ;;  %v425_v34 = vld [vmem:[%s1202_s3] sm:$0xff]  ;;  %v428_v38 = vld [vmem:[%s1202_s3 + $0x18] sm:$0xff] }
  0xeb   : > { %441 = vperm.xlu1 %850, %v427_v33   ;;  %431 = vperm.xlu0 %849, %v425_v34   ;;  %v745_v36 = vld [vmem:[%s1201_s2] sm:$0xff]  ;;  %v426_v39 = vld [vmem:[%s1202_s3 + $0x8] sm:$0xff]  ;;  %v495_v41 = vand.u32 127, %v494_v40 }
  0xed   : > { %vm504_vm3 = vcmp.ge.s32.totalorder %v495_v41, 1  ;;  %vm518_vm4 = vcmp.ge.s32.totalorder %v495_v41, 5  ;;  %vm533_vm5 = vcmp.ge.s32.totalorder %v495_v41, 14 }
  0xee   : > { %v416_v31 = vld [vmem:[#allocation2 + $0x8] sm:$0xff]  ;;  %v505_v42 = vsel %vm504_vm3, 1, %v964_v32  ;;  %v519_v43 = vsel %vm518_vm4, 1, %v964_v32  ;;  %v534_v45 = vsel %vm533_vm5, 1, %v964_v32 }
  0xef   : > { %v418_v28 = vld [vmem:[#allocation2 + $0x18] sm:$0xff]  ;;  %v419_v35 = vpack.c.bf16 %v416_v31, %v415_v29  ;;  %v520_v44 = vadd.s32 %v519_v43, %v505_v42 }
  0xf0   : > { %v420_v30 = vpack.c.bf16 %v418_v28, %v417_v27 }
  0xf1   : > { %v535_v48 = vadd.s32 %v534_v45, %v520_v44 }
  0xf2   : > { %472 = vmatpush.bf16.msra.mxu0 %v420_v30  ;;  %756 = vmatpush.bf16.msra.mxu1 %v420_v30 }
  0xf3   : > { %446 = vperm.xlu1 %850, %v428_v38   ;;  %436 = vperm.xlu0 %849, %v426_v39   ;;  %vm726_vm6 = vcmp.eq.s32.totalorder %v535_v48, 0  ;;  %vm728_vm7 = vcmp.eq.s32.totalorder %v535_v48, 2  ;;  %vm727_vm9 = vcmp.eq.s32.totalorder %v535_v48, 1  ;;  %vm729_vm10 = vcmp.eq.s32.totalorder %v535_v48, 3 }
  0xf6   : > { %473 = vmatpush.bf16.msra.mxu0 %v419_v35  ;;  %757 = vmatpush.bf16.msra.mxu1 %v419_v35 }
  0xf9   : > { %724 = vmatmul.msk.bf16.vlgmr.msra.gmra.mxu0 %vm459_vm2, %v745_v36  ;;  %725 = vmatmul.msk.bf16.vlgmr.msra.gmra.mxu1 %vm459_vm2, %v746_v37 }
 0x15d   : > { %v442_v46 = vpop.permute.xlu1 %441  ;;  %v432_v47 = vpop.permute.xlu0 %431 }
 0x165   : > { %v447_v59 = vpop.permute.xlu1 %446  ;;  %v437_v60 = vpop.permute.xlu0 %436 }
 0x176   : > { %v475_v49 = vpop.f32.mrf.mxu0  ;;  %v480_v50 = vpop.f32.mrf.mxu1 }
 0x177   : > { %v476_v51 = vadd.f32 %v475_v49, %v432_v47  ;;  %v481_v52 = vadd.f32 %v480_v50, %v442_v46 }
 0x179   : > { %v485_v53 = vmax.f32 %v476_v51, 0.0  ;;  %v487_v54 = vmax.f32 %v481_v52, 0.0 }
 0x17b   : > { %v540_v55 = vsel %vm726_vm6, %v485_v53, 0.0  ;;  %v542_v56 = vsel %vm728_vm7, %v487_v54, 0.0 }
 0x17c   : > { %v544_v57 = vpack.c.bf16 %v540_v55, %v540_v55  ;;  %v546_v58 = vpack.c.bf16 %v542_v56, %v542_v56 }
 0x17e   : > { %549 = vst.msk [vmem:[%s1106_s0] sm:$0xf] %vm548_vm8, %v544_v57  ;;  %v477_v61 = vpop.f32.mrf.mxu0  ;;  %v482_v62 = vpop.f32.mrf.mxu1 }
 0x17f   : > { %551 = vst.msk [vmem:[%s1106_s0 + $0x8] sm:$0xf] %vm548_vm8, %v546_v58  ;;  %v478_v63 = vadd.f32 %v477_v61, %v437_v60  ;;  %v483_v0 = vadd.f32 %v482_v62, %v447_v59 }
 0x181   : > { %v486_v1 = vmax.f32 %v478_v63, 0.0  ;;  %v488_v2 = vmax.f32 %v483_v0, 0.0 }
 0x183   : > { %v541_v3 = vsel %vm727_vm9, %v486_v1, 0.0  ;;  %v543_v4 = vsel %vm729_vm10, %v488_v2, 0.0 }
 0x184   : > { %v545_v5 = vpack.c.bf16 %v541_v3, %v541_v3  ;;  %v547_v6 = vpack.c.bf16 %v543_v4, %v543_v4 }
 0x186   : > { %550 = vst.msk [vmem:[%s1106_s0 + $0x4] sm:$0xf] %vm548_vm8, %v545_v5 }
 0x187   : > { %552 = vst.msk [vmem:[%s1106_s0 + $0xc] sm:$0xf] %vm548_vm8, %v547_v6 }
 0x188 PF: > { %s747_s5 = sshll.u32 %s949_s21, 4  ;;  %s566_s26 = sshll.u32 %s1106_s0, 4  ;;  %s567_s26 = int_to_ptr.vmem [resolvable:$true] %s566_s26 }
 0x189   : > { %s565_s20 = scalar_lea.hbm %s1203_s4, %s747_s5  ;;  %s554_s8 = scalar_lea.sflag [#allocation5], %s280_s13 }
 0x18a   : > { %s568_s30 = sshll.u32 %s565_s20, 4  ;;  %s871_s21 = scalar_lea.hbm %s1203_s4, 32  ;;  %s569_s30 = int_to_ptr.hbm [resolvable:$true] %s568_s30 }
 0x18b   : > { %s865_s9 = sshra.s32 %s569_s30, 4  ;;  %s866_s9 = int_to_ptr.hbm [resolvable:$true] %s865_s9 }
 0x18c   : > { %s867_s6 = scalar_lea.hbm %s866_s9, 16  ;;  %p872_p10 = scmp.lt.s32.totalorder %s866_s9, %s1203_s4 }
 0x18d   : > { %p868_p6 = scmp.ne.s32.totalorder %s866_s9, %s867_s6  ;;  %p873_p11 = scmp.lt.s32.totalorder %s871_s21, %s867_s6 }
 0x18f   : > { %p869_p8 = pnand %p868_p6, %p1064_p7  ;;  %p874_p13 = por %p873_p11, %p872_p10 }
 0x191   : > { %p870_p9 = pneg %p869_p8 }
 0x193   : > { %p875_p0 = pnand %p874_p13, %p870_p9 }
 0x195   : > { %878 = shalt.err (!%p875_p0)
}
 0x196   : > { %s965_s0 = smov 64   ;;  %s966_s13 = smov 4  }
 0x197   : > { %758 = dma.vmem_to_hbm [thread:$0]  (%p1064_p7), %s567_s26, 256, %s569_s30, %s554_s8, %s965_s0, %s965_s0, %s966_s13  }
 0x198 PF: > { %p764_p1 = scmp.ge.s32.totalorder %s961_s24, 2  ;;  %s583_s5 = sand.u32 1, %s925_s15  }
 0x199   : > { %s584_s1 = scalar_lea.sflag [#allocation5], %s583_s5 }
 0x19a   : > { %p761_p2 = pnand %p764_p1, %p1072_p12 }
 0x19c   : > { %p762_p3 = pneg %p761_p2 }
 0x19e   : > { %920 = dma.done.wait (%p762_p3), %s584_s1, 256  }
 0x19f   : > { %922 = vsyncadd (%p762_p3), %s584_s1, 4294967040  ;;  %s17_s24 = sadd.s32 1, %s961_s24   ;;  %s1211_s15 = smov %s929_s16 }
 0x1a0   : > { %p14_p4 = scmp.ge.s32.totalorder %s17_s24, 6   ;;  %s1212_s16 = smov %s933_s17 }
 0x1a1   : > { %s1213_s17 = smov %s1077_s11  ;;  %s1214_s18 = smov %s941_s19 }
 0x1a2   : > { %s1215_s19 = smov %s1080_s12  ;;  %s1216_s20 = smov %s953_s22 }
 0x1a3   : > { %s1217_s21 = smov %s957_s23  ;;  %s1218_s22 = smov %s1221_s27 }
 0x1a4   : > { %s1219_s23 = smov %s1225_s28  ;;  %16 = sbr.rel (!%p14_p4) target bundleno = 9 (0x9), region = 128 }
 0x1a9   :  { %590 = vsyncpa [#allocation5], 1 }
 0x1aa   :  { %592 = vsyncpa [#allocation5 + $0x1], 1 }

</bundles_post_ra>
